<compile_context>
chip_gen: v7x
topology: tpu7x:2x2x1
jax: 0.10.0
libtpu: 0.0.40
codegen_flags: <defaults>
</compile_context>

<pallas_src>
import math
import jax
import jax.numpy as jnp
from jax.experimental import pallas as pl
from jax.experimental.pallas import tpu as pltpu


def _round_up(x, m):
    return ((x + m - 1) // m) * m


def fnn_kernel(x_ref, w1_ref, b1_ref, w2_ref, b2_ref, w3_ref, b3_ref, o_ref):
    # fc1 + relu  (MXU, f32 accumulate)
    h1 = jnp.dot(x_ref[...], w1_ref[...], preferred_element_type=jnp.float32)
    h1 = jnp.maximum(h1 + b1_ref[...], 0.0)

    # fc2 + relu  (cast h1 to the weight dtype so the optional bf16 path hits the MXU)
    h2 = jnp.dot(h1.astype(w2_ref.dtype), w2_ref[...],
                 preferred_element_type=jnp.float32)
    h2 = jnp.maximum(h2 + b2_ref[...], 0.0)

    # out layer: N=1 -> VPU multiply + cross-lane reduce (XLU) instead of a 1-col MXU matmul
    y = jnp.sum(h2 * w3_ref[...], axis=-1, keepdims=True) + b3_ref[...]
    o_ref[...] = y.astype(o_ref.dtype)


def fnn_forward(x, params, *, block_b=512, use_bf16_matmul=False):
    """x: (B, input_dim) f32. params: W1,b1,W2,b2 (in x out), W3 (hidden,1), b3 (1,1)."""
    B, D = x.shape
    H = params["W1"].shape[1]

    w1, b1 = params["W1"], params["b1"]
    w2, b2 = params["W2"], params["b2"]
    w3_row = params["W3"].reshape(1, H)      # (H, 1) -> (1, H) for the lane reduce
    b3 = params["b3"].reshape(1, 1)

    # Batch tile: multiple of 8 sublanes, capped at block_b; pad B up to a whole
    # number of tiles (padded rows are computed and sliced off — they never alias
    # real outputs).
    tb = min(block_b, _round_up(B, 8))
    b_padded = _round_up(B, tb)
    if b_padded != B:
        x = jnp.pad(x, ((0, b_padded - B), (0, 0)))

    if use_bf16_matmul:
        # bf16 MXU inputs, f32 accumulation.  Bias / ReLU / final reduce stay f32
        # (v5e has no bf16 VPU path).
        x = x.astype(jnp.bfloat16)
        w1 = w1.astype(jnp.bfloat16)
        w2 = w2.astype(jnp.bfloat16)

    grid = (b_padded // tb,)

    out = pl.pallas_call(
        fnn_kernel,
        out_shape=jax.ShapeDtypeStruct((b_padded, 1), jnp.float32),
        grid=grid,
        in_specs=[
            pl.BlockSpec((tb, D), lambda i: (i, 0)),   # x: tiled over batch (pipelined)
            pl.BlockSpec((D, H), lambda i: (0, 0)),    # W1: VMEM-resident
            pl.BlockSpec((1, H), lambda i: (0, 0)),    # b1
            pl.BlockSpec((H, H), lambda i: (0, 0)),    # W2
            pl.BlockSpec((1, H), lambda i: (0, 0)),    # b2
            pl.BlockSpec((1, H), lambda i: (0, 0)),    # W3 as a row vector
            pl.BlockSpec((1, 1), lambda i: (0, 0)),    # b3
        ],
        out_specs=pl.BlockSpec((tb, 1), lambda i: (i, 0)),
        compiler_params=pltpu.CompilerParams(
            dimension_semantics=("parallel",),         # megacore on v7x; no-op on v5e/v6e
        ),
    )(x, w1, b1, w2, b2, w3_row, b3)

    return out[:B]


def init_params(key, input_dim, hidden_dim=32):
    """Deterministic init mimicking nn.Linear's U(-1/sqrt(fan_in), 1/sqrt(fan_in))."""
    ks = jax.random.split(key, 6)

    def lin(kw, kb, fan_in, fan_out):
        bound = 1.0 / math.sqrt(fan_in)
        W = jax.random.uniform(kw, (fan_in, fan_out), jnp.float32, -bound, bound)
        b = jax.random.uniform(kb, (1, fan_out), jnp.float32, -bound, bound)
        return W, b

    W1, b1 = lin(ks[0], ks[1], input_dim, hidden_dim)
    W2, b2 = lin(ks[2], ks[3], hidden_dim, hidden_dim)
    W3, b3 = lin(ks[4], ks[5], hidden_dim, 1)
    return {"W1": W1, "b1": b1, "W2": W2, "b2": b2, "W3": W3, "b3": b3}


if __name__ == "__main__":
    key = jax.random.PRNGKey(0)
    k_x, k_p = jax.random.split(key)

    # Non-multiple batch to exercise padding; block_b=256 -> 4 pipelined grid steps.
    batch, input_dim, hidden_dim = 1000, 16, 32
    x = jax.random.normal(k_x, (batch, input_dim), dtype=jnp.float32)
    params = init_params(k_p, input_dim, hidden_dim)

    out = fnn_forward(x, params, block_b=256, use_bf16_matmul=False)
    jax.block_until_ready(out)

    # Sanity check against pure-JAX reference.
    h1 = jnp.maximum(x @ params["W1"] + params["b1"], 0.0)
    h2 = jnp.maximum(h1 @ params["W2"] + params["b2"], 0.0)
    ref = h2 @ params["W3"] + params["b3"]
    assert out.shape == (batch, 1)
    assert jnp.allclose(out, ref, atol=1e-5, rtol=1e-5)

    print("KERNEL_OK")
</pallas_src>

<mosaic_0001>
module attributes {stable_mosaic.version = 11 : i64} {
  func.func @fnn_kernel(%arg0: i32, %arg1: memref<256x16xf32, #tpu.memory_space<vmem>>, %arg2: memref<16x32xf32, #tpu.memory_space<vmem>>, %arg3: memref<1x32xf32, #tpu.memory_space<vmem>>, %arg4: memref<32x32xf32, #tpu.memory_space<vmem>>, %arg5: memref<1x32xf32, #tpu.memory_space<vmem>>, %arg6: memref<1x32xf32, #tpu.memory_space<vmem>>, %arg7: memref<1x1xf32, #tpu.memory_space<vmem>>, %arg8: memref<256x1xf32, #tpu.memory_space<vmem>>) attributes {dimension_semantics = [#tpu.dimension_semantics<parallel>], iteration_bounds = array<i64: 4>, scalar_prefetch = 0 : i64, scratch_operands = 0 : i64, tpu.core_type = #tpu.core_type<tc>, window_params = [{transform_indices = @transform_0, window_bounds = array<i64: 256, 16>}, {pipeline_mode = #tpu.pipeline_mode<synchronous>, transform_indices = @transform_1, window_bounds = array<i64: 16, 32>}, {pipeline_mode = #tpu.pipeline_mode<synchronous>, transform_indices = @transform_2, window_bounds = array<i64: 1, 32>}, {pipeline_mode = #tpu.pipeline_mode<synchronous>, transform_indices = @transform_3, window_bounds = array<i64: 32, 32>}, {pipeline_mode = #tpu.pipeline_mode<synchronous>, transform_indices = @transform_4, window_bounds = array<i64: 1, 32>}, {pipeline_mode = #tpu.pipeline_mode<synchronous>, transform_indices = @transform_5, window_bounds = array<i64: 1, 32>}, {pipeline_mode = #tpu.pipeline_mode<synchronous>, transform_indices = @transform_6, window_bounds = array<i64: 1, 1>}, {transform_indices = @transform_7, window_bounds = array<i64: 256, 1>}]} {
    %c0 = arith.constant 0 : index
    %c0_0 = arith.constant 0 : index
    %0 = vector.load %arg1[%c0, %c0_0] : memref<256x16xf32, #tpu.memory_space<vmem>>, vector<256x16xf32>
    %c0_1 = arith.constant 0 : index
    %c0_2 = arith.constant 0 : index
    %1 = vector.load %arg2[%c0_1, %c0_2] : memref<16x32xf32, #tpu.memory_space<vmem>>, vector<16x32xf32>
    %cst = arith.constant dense<0.000000e+00> : vector<256x32xf32>
    %2 = tpu.matmul %0, %1, %cst {dimension_numbers = #tpu.dot_dimension_numbers<[1], [0], [0], [1], [0, 0, 1, 1], [], []>} : vector<256x16xf32>, vector<16x32xf32>, vector<256x32xf32> -> vector<256x32xf32>
    %c0_3 = arith.constant 0 : index
    %c0_4 = arith.constant 0 : index
    %3 = vector.load %arg3[%c0_3, %c0_4] : memref<1x32xf32, #tpu.memory_space<vmem>>, vector<1x32xf32>
    %4 = vector.broadcast %3 : vector<1x32xf32> to vector<256x32xf32>
    %5 = arith.addf %2, %4 : vector<256x32xf32>
    %cst_5 = arith.constant 0.000000e+00 : f32
    %6 = vector.broadcast %cst_5 : f32 to vector<256x32xf32>
    %7 = arith.maximumf %5, %6 : vector<256x32xf32>
    %c0_6 = arith.constant 0 : index
    %c0_7 = arith.constant 0 : index
    %8 = vector.load %arg4[%c0_6, %c0_7] : memref<32x32xf32, #tpu.memory_space<vmem>>, vector<32x32xf32>
    %cst_8 = arith.constant dense<0.000000e+00> : vector<256x32xf32>
    %9 = tpu.matmul %7, %8, %cst_8 {dimension_numbers = #tpu.dot_dimension_numbers<[1], [0], [0], [1], [0, 0, 1, 1], [], []>} : vector<256x32xf32>, vector<32x32xf32>, vector<256x32xf32> -> vector<256x32xf32>
    %c0_9 = arith.constant 0 : index
    %c0_10 = arith.constant 0 : index
    %10 = vector.load %arg5[%c0_9, %c0_10] : memref<1x32xf32, #tpu.memory_space<vmem>>, vector<1x32xf32>
    %11 = vector.broadcast %10 : vector<1x32xf32> to vector<256x32xf32>
    %12 = arith.addf %9, %11 : vector<256x32xf32>
    %cst_11 = arith.constant 0.000000e+00 : f32
    %13 = vector.broadcast %cst_11 : f32 to vector<256x32xf32>
    %14 = arith.maximumf %12, %13 : vector<256x32xf32>
    %c0_12 = arith.constant 0 : index
    %c0_13 = arith.constant 0 : index
    %15 = vector.load %arg6[%c0_12, %c0_13] : memref<1x32xf32, #tpu.memory_space<vmem>>, vector<1x32xf32>
    %16 = vector.broadcast %15 : vector<1x32xf32> to vector<256x32xf32>
    %17 = arith.mulf %14, %16 : vector<256x32xf32>
    %cst_14 = arith.constant dense<0.000000e+00> : vector<256xf32>
    %18 = vector.multi_reduction <add>, %17, %cst_14 [1] : vector<256x32xf32> to vector<256xf32>
    %19 = vector.shape_cast %18 : vector<256xf32> to vector<256x1xf32>
    %c0_15 = arith.constant 0 : index
    %c0_16 = arith.constant 0 : index
    %20 = vector.load %arg7[%c0_15, %c0_16] : memref<1x1xf32, #tpu.memory_space<vmem>>, vector<1x1xf32>
    %21 = vector.broadcast %20 : vector<1x1xf32> to vector<256x1xf32>
    %22 = arith.addf %19, %21 : vector<256x1xf32>
    %c0_17 = arith.constant 0 : index
    %c0_18 = arith.constant 0 : index
    %23 = vector.load %arg8[%c0_17, %c0_18] : memref<256x1xf32, #tpu.memory_space<vmem>>, vector<256x1xf32>
    tpu.vector_store %arg8[%c0_17, %c0_18], %22 {strides = array<i32>} : memref<256x1xf32, #tpu.memory_space<vmem>>, vector<256x1xf32>,
    return
  }
  func.func @transform_0(%arg0: i32) -> (i32, i32) {
    %c0_i32 = arith.constant 0 : i32
    %c0_i32_0 = arith.constant 0 : i32
    return %arg0, %c0_i32 : i32, i32
  }
  func.func @transform_1(%arg0: i32) -> (i32, i32) {
    %c0_i32 = arith.constant 0 : i32
    %c0_i32_0 = arith.constant 0 : i32
    %c0_i32_1 = arith.constant 0 : i32
    return %c0_i32, %c0_i32_0 : i32, i32
  }
  func.func @transform_2(%arg0: i32) -> (i32, i32) {
    %c0_i32 = arith.constant 0 : i32
    %c0_i32_0 = arith.constant 0 : i32
    %c0_i32_1 = arith.constant 0 : i32
    return %c0_i32, %c0_i32_0 : i32, i32
  }
  func.func @transform_3(%arg0: i32) -> (i32, i32) {
    %c0_i32 = arith.constant 0 : i32
    %c0_i32_0 = arith.constant 0 : i32
    %c0_i32_1 = arith.constant 0 : i32
    return %c0_i32, %c0_i32_0 : i32, i32
  }
  func.func @transform_4(%arg0: i32) -> (i32, i32) {
    %c0_i32 = arith.constant 0 : i32
    %c0_i32_0 = arith.constant 0 : i32
    %c0_i32_1 = arith.constant 0 : i32
    return %c0_i32, %c0_i32_0 : i32, i32
  }
  func.func @transform_5(%arg0: i32) -> (i32, i32) {
    %c0_i32 = arith.constant 0 : i32
    %c0_i32_0 = arith.constant 0 : i32
    %c0_i32_1 = arith.constant 0 : i32
    return %c0_i32, %c0_i32_0 : i32, i32
  }
  func.func @transform_6(%arg0: i32) -> (i32, i32) {
    %c0_i32 = arith.constant 0 : i32
    %c0_i32_0 = arith.constant 0 : i32
    %c0_i32_1 = arith.constant 0 : i32
    return %c0_i32, %c0_i32_0 : i32, i32
  }
  func.func @transform_7(%arg0: i32) -> (i32, i32) {
    %c0_i32 = arith.constant 0 : i32
    %c0_i32_0 = arith.constant 0 : i32
    return %arg0, %c0_i32 : i32, i32
  }
}

</mosaic_0001>

<bundles_post_ra>
// kernel: tpu_custom_call.1
= control target key start
LH: loop header
LB: loop body
LE: loop exit
PB: predicated region body
PF: predicated region fallthrough
CT: control target
= control target key end

     0   :  { %s1635_s26 = smov 0   ;;  %s2018_s0 = inlined_call_operand.vmem [shape: f32[1024,16], index: 0, kind: input, shape index: {}]   ;;  %s2019_s1 = inlined_call_operand.vmem [shape: f32[16,32], index: 1, kind: input, shape index: {}]   ;;  %s2020_s2 = inlined_call_operand.vmem [shape: f32[1,32], index: 2, kind: input, shape index: {}]   ;;  %s2021_s3 = inlined_call_operand.vmem [shape: f32[32,32], index: 3, kind: input, shape index: {}]   ;;  %s2022_s4 = inlined_call_operand.vmem [shape: f32[1,32], index: 4, kind: input, shape index: {}]   ;;  %s2023_s5 = inlined_call_operand.vmem [shape: f32[1,32], index: 5, kind: input, shape index: {}]   ;;  %s2024_s6 = inlined_call_operand.<no memory space> [shape: f32[1,1], index: 6, kind: input, shape index: {}]   ;;  %s2025_s7 = inlined_call_operand.vmem [shape: f32[1024,1], index: 7, kind: output, shape index: {}]  }
   0x1   :  { %v12_v0 = vstv %s2024_s6 }
   0x2   :  { %13 = vst [vmem:[#allocation2] sm:$0x1] %v12_v0 }
   0x3 LB: > { %s1307_s27 = sadd.s32 4294967295, %s1590_s26   ;;  %p1311_p0 = scmp.ge.s32.totalorder %s1590_s26, 1  ;;  %s1590_s26 = sphi %s1635_s26, %s19_s26  }
   0x4   : > { %p240_p1 = scmp.lt.s32.totalorder %s1590_s26, 5 }
   0x6   : > { %p241_p2 = pnand %p1311_p0, %p240_p1 }
   0x7   : > { %v316_v1 = vld [vmem:[%s2019_s1] sm:$0xff] (!%p241_p2)  ;;  %v317_v2 = vld [vmem:[%s2019_s1 + $0x8] sm:$0xff] (!%p241_p2)  ;;  %s1312_s8 = sshll.u32 (!%p241_p2), %s1307_s27, 5  ;;  %vm325_vm0 = vcmask (!%p241_p2), 130048   ;;  %v681_v39 = vld [vmem:[%s2021_s3 + $0x10] sm:$0xff] (!%p241_p2)  ;;  %vm690_vm1 = vcmask (!%p241_p2), 261120  }
   0x8   : > { %244 = sbr.rel (%p241_p2) target bundleno = 666 (0x29a), region = 48  ;;  %v679_v3 = vld [vmem:[%s2021_s3] sm:$0xff] (!%p241_p2)  ;;  %v1564_v4 = vpack.c.bf16 (!%p241_p2), %v317_v2, %v316_v1  ;;  %p273_p3 = scmp.lt.s32.totalorder (!%p241_p2), %s1312_s8, 127  ;;  %v680_v5 = vld [vmem:[%s2021_s3 + $0x8] sm:$0xff] (!%p241_p2)  ;;  %v682_v40 = vld [vmem:[%s2021_s3 + $0x18] sm:$0xff] (!%p241_p2)  ;;  %vm1218_vm2 = vcmask (!%p241_p2), 7168  }
   0x9   : > { %v1568_v6 = vpack.c.bf16 (!%p241_p2), %v680_v5, %v679_v3  ;;  %v1572_v41 = vpack.c.bf16 (!%p241_p2), %v682_v40, %v681_v39  ;;  %v1738_v42 = vld [vmem:[%s2020_s2] ss:$0 sm:$0xff] (!%p241_p2) }
   0xa   : > { %1565 = vmatprep.subr.bf16.mxu0 (!%p241_p2), %v1564_v4 }
   0xb   : > { %1567 = vmatpush3.bf16.msra.mxu0 (!%p241_p2), %v1564_v4  ;;  %1569 = vmatprep.subr.bf16.mxu1 (!%p241_p2), %v1568_v6 }
   0xc   : > { %1571 = vmatpush3.bf16.msra.mxu1 (!%p241_p2), %v1568_v6 }
   0xd   : > { %1573 = vmatprep.subr.bf16.mxu1 (!%p241_p2), %v1572_v41 }
   0xf   : > { %s2027_s8 = smov (!%p273_p3, %s1312_s8), 127 }
  0x10   : > { %s1313_s13 = sshll.u32 %s2027_s8, 3  ;;  %1575 = vmatpush3.bf16.msra.mxu1 %v1572_v41 }
  0x11   : > { %s1663_s16 = scalar_lea.vmem %s2018_s0, %s1313_s13  ;;  %s1917_s6 = scalar_lea.vmem %s2025_s7, %s1313_s13 }
  0x12   : > { %v284_v7 = vld [vmem:[%s1663_s16] sm:$0xff]  ;;  %v285_v8 = vld [vmem:[%s1663_s16 + $0x8] sm:$0xff]  ;;  %v286_v9 = vld [vmem:[%s1663_s16 + $0x10] sm:$0xff] }
  0x13   : > { %1460 = vmatprep.mubr.msk.f32.mxu0 %vm325_vm0, %v284_v7  ;;  %v287_v10 = vld [vmem:[%s1663_s16 + $0x18] sm:$0xff]  ;;  %v288_v11 = vld [vmem:[%s1663_s16 + $0x20] sm:$0xff]  ;;  %v289_v12 = vld [vmem:[%s1663_s16 + $0x28] sm:$0xff] }
  0x14   : > { %1461 = vmatmul.mubr.msk.f32.vlgmr.msra.gmra.mrb[0].mxu0 %vm325_vm0, %v285_v8  ;;  %v290_v13 = vld [vmem:[%s1663_s16 + $0x30] sm:$0xff]  ;;  %v291_v14 = vld [vmem:[%s1663_s16 + $0x38] sm:$0xff]  ;;  %v292_v15 = vld [vmem:[%s1663_s16 + $0x40] sm:$0xff] }
  0x15   : > { %1463 = vmatprep.mubr.msk.f32.mxu0 %vm325_vm0, %v286_v9  ;;  %v293_v16 = vld [vmem:[%s1663_s16 + $0x48] sm:$0xff]  ;;  %v294_v17 = vld [vmem:[%s1663_s16 + $0x50] sm:$0xff]  ;;  %v295_v18 = vld [vmem:[%s1663_s16 + $0x58] sm:$0xff] }
  0x16   : > { %v296_v19 = vld [vmem:[%s1663_s16 + $0x60] sm:$0xff]  ;;  %v297_v20 = vld [vmem:[%s1663_s16 + $0x68] sm:$0xff]  ;;  %v298_v21 = vld [vmem:[%s1663_s16 + $0x70] sm:$0xff] }
  0x17   : > { %v299_v22 = vld [vmem:[%s1663_s16 + $0x78] sm:$0xff]  ;;  %v300_v23 = vld [vmem:[%s1663_s16 + $0x80] sm:$0xff]  ;;  %v301_v24 = vld [vmem:[%s1663_s16 + $0x88] sm:$0xff] }
  0x18   : > { %1464 = vmatmul.mubr.msk.f32.gmra.mrb[2].mxu0 %vm325_vm0, %v287_v10  ;;  %v302_v25 = vld [vmem:[%s1663_s16 + $0x90] sm:$0xff]  ;;  %v303_v26 = vld [vmem:[%s1663_s16 + $0x98] sm:$0xff]  ;;  %v304_v27 = vld [vmem:[%s1663_s16 + $0xa0] sm:$0xff] }
  0x19   : > { %1466 = vmatprep.mubr.msk.f32.mxu0 %vm325_vm0, %v288_v11  ;;  %v305_v28 = vld [vmem:[%s1663_s16 + $0xa8] sm:$0xff]  ;;  %v306_v29 = vld [vmem:[%s1663_s16 + $0xb0] sm:$0xff]  ;;  %v307_v30 = vld [vmem:[%s1663_s16 + $0xb8] sm:$0xff] }
  0x1a   : > { %v308_v31 = vld [vmem:[%s1663_s16 + $0xc0] sm:$0xff]  ;;  %v309_v32 = vld [vmem:[%s1663_s16 + $0xc8] sm:$0xff]  ;;  %v310_v33 = vld [vmem:[%s1663_s16 + $0xd0] sm:$0xff] }
  0x1b   : > { %v311_v34 = vld [vmem:[%s1663_s16 + $0xd8] sm:$0xff]  ;;  %v312_v35 = vld [vmem:[%s1663_s16 + $0xe0] sm:$0xff]  ;;  %v313_v36 = vld [vmem:[%s1663_s16 + $0xe8] sm:$0xff] }
  0x1c   : > { %1467 = vmatmul.mubr.msk.f32.gmra.mrb[4].mxu0 %vm325_vm0, %v289_v12  ;;  %v314_v37 = vld [vmem:[%s1663_s16 + $0xf0] sm:$0xff]  ;;  %v315_v38 = vld [vmem:[%s1663_s16 + $0xf8] sm:$0xff] }
  0x1d   : > { %1469 = vmatprep.mubr.msk.f32.mxu0 %vm325_vm0, %v290_v13 }
  0x20   : > { %1470 = vmatmul.mubr.msk.f32.gmra.mrb[6].mxu0 %vm325_vm0, %v291_v14 }
  0x21   : > { %1472 = vmatprep.mubr.msk.f32.mxu0 %vm325_vm0, %v292_v15 }
  0x24   : > { %1473 = vmatmul.mubr.msk.f32.gmra.mrb[8].mxu0 %vm325_vm0, %v293_v16 }
  0x25   : > { %1475 = vmatprep.mubr.msk.f32.mxu0 %vm325_vm0, %v294_v17 }
  0x28   : > { %1476 = vmatmul.mubr.msk.f32.gmra.mrb[10].mxu0 %vm325_vm0, %v295_v18 }
  0x29   : > { %1478 = vmatprep.mubr.msk.f32.mxu0 %vm325_vm0, %v296_v19 }
  0x2c   : > { %1479 = vmatmul.mubr.msk.f32.gmra.mrb[12].mxu0 %vm325_vm0, %v297_v20 }
  0x2d   : > { %1481 = vmatprep.mubr.msk.f32.mxu0 %vm325_vm0, %v298_v21 }
  0x30   : > { %1482 = vmatmul.mubr.msk.f32.gmra.mrb[14].mxu0 %vm325_vm0, %v299_v22 }
  0x31   : > { %1484 = vmatprep.mubr.msk.f32.mxu0 %vm325_vm0, %v300_v23 }
  0x34   : > { %1485 = vmatmul.mubr.msk.f32.gmra.mrb[16].mxu0 %vm325_vm0, %v301_v24 }
  0x35   : > { %1487 = vmatprep.mubr.msk.f32.mxu0 %vm325_vm0, %v302_v25 }
  0x38   : > { %1488 = vmatmul.mubr.msk.f32.gmra.mrb[18].mxu0 %vm325_vm0, %v303_v26 }
  0x39   : > { %1490 = vmatprep.mubr.msk.f32.mxu0 %vm325_vm0, %v304_v27 }
  0x3c   : > { %1491 = vmatmul.mubr.msk.f32.gmra.mrb[20].mxu0 %vm325_vm0, %v305_v28 }
  0x3d   : > { %1493 = vmatprep.mubr.msk.f32.mxu0 %vm325_vm0, %v306_v29 }
  0x40   : > { %1494 = vmatmul.mubr.msk.f32.gmra.mrb[22].mxu0 %vm325_vm0, %v307_v30 }
  0x41   : > { %1496 = vmatprep.mubr.msk.f32.mxu0 %vm325_vm0, %v308_v31 }
  0x44   : > { %1497 = vmatmul.mubr.msk.f32.gmra.mrb[24].mxu0 %vm325_vm0, %v309_v32 }
  0x45   : > { %1499 = vmatprep.mubr.msk.f32.mxu0 %vm325_vm0, %v310_v33 }
  0x48   : > { %1500 = vmatmul.mubr.msk.f32.gmra.mrb[26].mxu0 %vm325_vm0, %v311_v34 }
  0x49   : > { %1502 = vmatprep.mubr.msk.f32.mxu0 %vm325_vm0, %v312_v35 }
  0x4c   : > { %1503 = vmatmul.mubr.msk.f32.gmra.mrb[28].mxu0 %vm325_vm0, %v313_v36 }
  0x4d   : > { %1505 = vmatprep.mubr.msk.f32.mxu0 %vm325_vm0, %v314_v37 }
  0x50   : > { %1506 = vmatmul.mubr.msk.f32.gmra.mrb[30].mxu0 %vm325_vm0, %v315_v38 }
  0xe7   : > { %v1462_v43 = vpop.f32.mrb[0].mxu0 }
  0xe8   : > { %v494_v44 = vadd.f32 %v1462_v43, %v1738_v42  ;;  %v488_v45 = vpop.f32.mrb[1].mxu0 }
  0xe9   : > { %v489_v46 = vadd.f32 %v1738_v42, %v488_v45 }
  0xea   : > { %v648_v49 = vmax.f32 %v494_v44, 0.0 }
  0xeb   : > { %v647_v47 = vmax.f32 %v489_v46, 0.0  ;;  %v1465_v48 = vpop.f32.mrb[2].mxu0 }
  0xec   : > { %v504_v50 = vadd.f32 %v1465_v48, %v1738_v42  ;;  %v498_v51 = vpop.f32.mrb[3].mxu0 }
  0xed   : > { %v499_v52 = vadd.f32 %v1738_v42, %v498_v51  ;;  %1516 = vmatprep.mubr.msk.f32.mxu1 %vm690_vm1, %v647_v47 }
  0xee   : > { %1517 = vmatmul.mubr.msk.f32.vlgmr.msra.gmra.mrb[0].mxu1 %vm690_vm1, %v648_v49  ;;  %v650_v55 = vmax.f32 %v504_v50, 0.0 }
  0xef   : > { %v649_v53 = vmax.f32 %v499_v52, 0.0  ;;  %v1468_v54 = vpop.f32.mrb[4].mxu0 }
  0xf0   : > { %v514_v56 = vadd.f32 %v1468_v54, %v1738_v42  ;;  %v508_v57 = vpop.f32.mrb[5].mxu0 }
  0xf1   : > { %v509_v58 = vadd.f32 %v1738_v42, %v508_v57  ;;  %1519 = vmatprep.mubr.msk.f32.mxu1 %vm690_vm1, %v649_v53 }
  0xf2   : > { %v652_v59 = vmax.f32 %v514_v56, 0.0  ;;  %1520 = vmatmul.mubr.msk.f32.gmra.mrb[2].mxu1 %vm690_vm1, %v650_v55 }
  0xf3   : > { %v651_v60 = vmax.f32 %v509_v58, 0.0  ;;  %v1471_v61 = vpop.f32.mrb[6].mxu0 }
  0xf4   : > { %v524_v62 = vadd.f32 %v1471_v61, %v1738_v42  ;;  %v518_v63 = vpop.f32.mrb[7].mxu0 }
  0xf5   : > { %v519_v0 = vadd.f32 %v1738_v42, %v518_v63  ;;  %1522 = vmatprep.mubr.msk.f32.mxu1 %vm690_vm1, %v651_v60 }
  0xf6   : > { %v654_v1 = vmax.f32 %v524_v62, 0.0  ;;  %1523 = vmatmul.mubr.msk.f32.gmra.mrb[4].mxu1 %vm690_vm1, %v652_v59 }
  0xf7   : > { %v653_v2 = vmax.f32 %v519_v0, 0.0  ;;  %v1474_v3 = vpop.f32.mrb[8].mxu0 }
  0xf8   : > { %v534_v4 = vadd.f32 %v1474_v3, %v1738_v42  ;;  %v528_v5 = vpop.f32.mrb[9].mxu0 }
  0xf9   : > { %v529_v6 = vadd.f32 %v1738_v42, %v528_v5  ;;  %1525 = vmatprep.mubr.msk.f32.mxu1 %vm690_vm1, %v653_v2 }
  0xfa   : > { %v656_v7 = vmax.f32 %v534_v4, 0.0  ;;  %1526 = vmatmul.mubr.msk.f32.gmra.mrb[6].mxu1 %vm690_vm1, %v654_v1 }
  0xfb   : > { %v655_v8 = vmax.f32 %v529_v6, 0.0  ;;  %v1477_v9 = vpop.f32.mrb[10].mxu0 }
  0xfc   : > { %v544_v10 = vadd.f32 %v1477_v9, %v1738_v42  ;;  %v538_v11 = vpop.f32.mrb[11].mxu0 }
  0xfd   : > { %v539_v12 = vadd.f32 %v1738_v42, %v538_v11  ;;  %1528 = vmatprep.mubr.msk.f32.mxu1 %vm690_vm1, %v655_v8 }
  0xfe   : > { %v658_v13 = vmax.f32 %v544_v10, 0.0  ;;  %1529 = vmatmul.mubr.msk.f32.gmra.mrb[8].mxu1 %vm690_vm1, %v656_v7 }
  0xff   : > { %v657_v14 = vmax.f32 %v539_v12, 0.0  ;;  %v1480_v15 = vpop.f32.mrb[12].mxu0  ;;  %v1807_v12 = vld [vmem:[%s2022_s4] ss:$0 sm:$0xff] }
 0x100   : > { %v554_v16 = vadd.f32 %v1480_v15, %v1738_v42  ;;  %v548_v17 = vpop.f32.mrb[13].mxu0 }
 0x101   : > { %v549_v18 = vadd.f32 %v1738_v42, %v548_v17  ;;  %1531 = vmatprep.mubr.msk.f32.mxu1 %vm690_vm1, %v657_v14 }
 0x102   : > { %v660_v19 = vmax.f32 %v554_v16, 0.0  ;;  %1532 = vmatmul.mubr.msk.f32.gmra.mrb[10].mxu1 %vm690_vm1, %v658_v13  ;;  %v1814_v16 = vld [vmem:[%s2023_s5] ss:$0 sm:$0xff] }
 0x103   : > { %v659_v20 = vmax.f32 %v549_v18, 0.0  ;;  %v1483_v21 = vpop.f32.mrb[14].mxu0 }
 0x104   : > { %v564_v22 = vadd.f32 %v1483_v21, %v1738_v42  ;;  %v558_v23 = vpop.f32.mrb[15].mxu0 }
 0x105   : > { %v559_v24 = vadd.f32 %v1738_v42, %v558_v23  ;;  %1534 = vmatprep.mubr.msk.f32.mxu1 %vm690_vm1, %v659_v20 }
 0x106   : > { %v662_v25 = vmax.f32 %v564_v22, 0.0  ;;  %1535 = vmatmul.mubr.msk.f32.gmra.mrb[12].mxu1 %vm690_vm1, %v660_v19 }
 0x107   : > { %v661_v26 = vmax.f32 %v559_v24, 0.0  ;;  %v1486_v27 = vpop.f32.mrb[16].mxu0 }
 0x108   : > { %v574_v28 = vadd.f32 %v1486_v27, %v1738_v42  ;;  %v568_v29 = vpop.f32.mrb[17].mxu0 }
 0x109   : > { %v569_v30 = vadd.f32 %v1738_v42, %v568_v29  ;;  %1537 = vmatprep.mubr.msk.f32.mxu1 %vm690_vm1, %v661_v26 }
 0x10a   : > { %v664_v31 = vmax.f32 %v574_v28, 0.0  ;;  %1538 = vmatmul.mubr.msk.f32.gmra.mrb[14].mxu1 %vm690_vm1, %v662_v25 }
 0x10b   : > { %v663_v32 = vmax.f32 %v569_v30, 0.0  ;;  %v1489_v33 = vpop.f32.mrb[18].mxu0 }
 0x10c   : > { %v584_v34 = vadd.f32 %v1489_v33, %v1738_v42  ;;  %v578_v35 = vpop.f32.mrb[19].mxu0 }
 0x10d   : > { %v579_v36 = vadd.f32 %v1738_v42, %v578_v35  ;;  %1540 = vmatprep.mubr.msk.f32.mxu1 %vm690_vm1, %v663_v32 }
 0x10e   : > { %v666_v37 = vmax.f32 %v584_v34, 0.0  ;;  %1541 = vmatmul.mubr.msk.f32.gmra.mrb[16].mxu1 %vm690_vm1, %v664_v31 }
 0x10f   : > { %v665_v38 = vmax.f32 %v579_v36, 0.0  ;;  %v1492_v39 = vpop.f32.mrb[20].mxu0 }
 0x110   : > { %v594_v40 = vadd.f32 %v1492_v39, %v1738_v42  ;;  %v588_v41 = vpop.f32.mrb[21].mxu0 }
 0x111   : > { %v589_v43 = vadd.f32 %v1738_v42, %v588_v41  ;;  %1543 = vmatprep.mubr.msk.f32.mxu1 %vm690_vm1, %v665_v38 }
 0x112   : > { %v668_v44 = vmax.f32 %v594_v40, 0.0  ;;  %1544 = vmatmul.mubr.msk.f32.gmra.mrb[18].mxu1 %vm690_vm1, %v666_v37 }
 0x113   : > { %v667_v45 = vmax.f32 %v589_v43, 0.0  ;;  %v1495_v46 = vpop.f32.mrb[22].mxu0 }
 0x114   : > { %v604_v47 = vadd.f32 %v1495_v46, %v1738_v42  ;;  %v598_v48 = vpop.f32.mrb[23].mxu0 }
 0x115   : > { %v599_v49 = vadd.f32 %v1738_v42, %v598_v48  ;;  %1546 = vmatprep.mubr.msk.f32.mxu1 %vm690_vm1, %v667_v45 }
 0x116   : > { %v670_v50 = vmax.f32 %v604_v47, 0.0  ;;  %1547 = vmatmul.mubr.msk.f32.gmra.mrb[20].mxu1 %vm690_vm1, %v668_v44 }
 0x117   : > { %v669_v51 = vmax.f32 %v599_v49, 0.0  ;;  %v1498_v52 = vpop.f32.mrb[24].mxu0 }
 0x118   : > { %v614_v53 = vadd.f32 %v1498_v52, %v1738_v42  ;;  %v608_v54 = vpop.f32.mrb[25].mxu0 }
 0x119   : > { %v609_v55 = vadd.f32 %v1738_v42, %v608_v54  ;;  %1549 = vmatprep.mubr.msk.f32.mxu1 %vm690_vm1, %v669_v51 }
 0x11a   : > { %v672_v56 = vmax.f32 %v614_v53, 0.0  ;;  %1550 = vmatmul.mubr.msk.f32.gmra.mrb[22].mxu1 %vm690_vm1, %v670_v50 }
 0x11b   : > { %v671_v57 = vmax.f32 %v609_v55, 0.0  ;;  %v1501_v58 = vpop.f32.mrb[26].mxu0 }
 0x11c   : > { %v624_v59 = vadd.f32 %v1501_v58, %v1738_v42  ;;  %v618_v60 = vpop.f32.mrb[27].mxu0 }
 0x11d   : > { %v619_v61 = vadd.f32 %v1738_v42, %v618_v60  ;;  %1552 = vmatprep.mubr.msk.f32.mxu1 %vm690_vm1, %v671_v57 }
 0x11e   : > { %v674_v62 = vmax.f32 %v624_v59, 0.0  ;;  %1553 = vmatmul.mubr.msk.f32.gmra.mrb[24].mxu1 %vm690_vm1, %v672_v56 }
 0x11f   : > { %v673_v63 = vmax.f32 %v619_v61, 0.0  ;;  %v1504_v0 = vpop.f32.mrb[28].mxu0 }
 0x120   : > { %v634_v1 = vadd.f32 %v1504_v0, %v1738_v42  ;;  %v628_v2 = vpop.f32.mrb[29].mxu0 }
 0x121   : > { %v629_v3 = vadd.f32 %v1738_v42, %v628_v2  ;;  %1555 = vmatprep.mubr.msk.f32.mxu1 %vm690_vm1, %v673_v63 }
 0x122   : > { %v676_v4 = vmax.f32 %v634_v1, 0.0  ;;  %1556 = vmatmul.mubr.msk.f32.gmra.mrb[26].mxu1 %vm690_vm1, %v674_v62 }
 0x123   : > { %v675_v5 = vmax.f32 %v629_v3, 0.0  ;;  %v1507_v6 = vpop.f32.mrb[30].mxu0 }
 0x124   : > { %v644_v7 = vadd.f32 %v1507_v6, %v1738_v42  ;;  %v638_v8 = vpop.f32.mrb[31].mxu0 }
 0x125   : > { %v639_v9 = vadd.f32 %v1738_v42, %v638_v8  ;;  %1558 = vmatprep.mubr.msk.f32.mxu1 %vm690_vm1, %v675_v5 }
 0x126   : > { %v678_v10 = vmax.f32 %v644_v7, 0.0  ;;  %1559 = vmatmul.mubr.msk.f32.gmra.mrb[28].mxu1 %vm690_vm1, %v676_v4 }
 0x127   : > { %v677_v11 = vmax.f32 %v639_v9, 0.0 }
 0x129   : > { %1561 = vmatprep.mubr.msk.f32.mxu1 %vm690_vm1, %v677_v11 }
 0x12a   : > { %1562 = vmatmul.mubr.msk.f32.gmra.mrb[30].mxu1 %vm690_vm1, %v678_v10 }
 0x1c1   : > { %v1518_v13 = vpop.f32.mrb[0].mxu1 }
 0x1c2   : > { %v859_v14 = vadd.f32 %v1518_v13, %v1807_v12  ;;  %v853_v15 = vpop.f32.mrb[1].mxu1 }
 0x1c3   : > { %v854_v42 = vadd.f32 %v1807_v12, %v853_v15 }
 0x1c4   : > { %v1013_v17 = vmax.f32 %v859_v14, 0.0 }
 0x1c5   : > { %v1012_v18 = vmax.f32 %v854_v42, 0.0  ;;  %v1521_v19 = vpop.f32.mrb[2].mxu1 }
 0x1c6   : > { %v869_v20 = vadd.f32 %v1521_v19, %v1807_v12  ;;  %v863_v21 = vpop.f32.mrb[3].mxu1  ;;  %v1052_v22 = vmul.f32 %v1814_v16, %v1013_v17 }
 0x1c7   : > { %v864_v23 = vadd.f32 %v1807_v12, %v863_v21  ;;  %v1051_v26 = vmul.f32 %v1814_v16, %v1012_v18 }
 0x1c8   : > { %v1015_v24 = vmax.f32 %v869_v20, 0.0  ;;  %v1086_v25 = vsel %vm690_vm1, %v1052_v22, 0.0 }
 0x1c9   : > { %v1014_v27 = vmax.f32 %v864_v23, 0.0  ;;  %1087 = vadd.xlane.f32.xlu0 %v1086_v25  ;;  %v1524_v28 = vpop.f32.mrb[4].mxu1  ;;  %v1083_v35 = vsel %vm690_vm1, %v1051_v26, 0.0 }
 0x1ca   : > { %v879_v29 = vadd.f32 %v1524_v28, %v1807_v12  ;;  %v873_v30 = vpop.f32.mrb[5].mxu1  ;;  %v1054_v31 = vmul.f32 %v1814_v16, %v1015_v24 }
 0x1cb   : > { %v874_v32 = vadd.f32 %v1807_v12, %v873_v30  ;;  %v1053_v36 = vmul.f32 %v1814_v16, %v1014_v27 }
 0x1cc   : > { %v1017_v33 = vmax.f32 %v879_v29, 0.0  ;;  %v1092_v34 = vsel %vm690_vm1, %v1054_v31, 0.0 }
 0x1cd   : > { %v1016_v37 = vmax.f32 %v874_v32, 0.0  ;;  %1093 = vadd.xlane.f32.xlu1 %v1092_v34  ;;  %v1527_v38 = vpop.f32.mrb[6].mxu1  ;;  %1084 = vadd.xlane.f32.xlu0 %v1083_v35  ;;  %v1089_v45 = vsel %vm690_vm1, %v1053_v36, 0.0 }
 0x1ce   : > { %v889_v39 = vadd.f32 %v1527_v38, %v1807_v12  ;;  %v883_v40 = vpop.f32.mrb[7].mxu1  ;;  %v1056_v46 = vmul.f32 %v1814_v16, %v1017_v33 }
 0x1cf   : > { %v884_v41 = vadd.f32 %v1807_v12, %v883_v40  ;;  %v1055_v43 = vmul.f32 %v1814_v16, %v1016_v37 }
 0x1d0   : > { %v1019_v44 = vmax.f32 %v889_v39, 0.0  ;;  %v1098_v55 = vsel %vm690_vm1, %v1056_v46, 0.0 }
 0x1d1   : > { %v1018_v47 = vmax.f32 %v884_v41, 0.0  ;;  %v1530_v48 = vpop.f32.mrb[8].mxu1  ;;  %1090 = vadd.xlane.f32.xlu1 %v1089_v45  ;;  %v1095_v49 = vsel %vm690_vm1, %v1055_v43, 0.0 }
 0x1d2   : > { %v899_v50 = vadd.f32 %v1530_v48, %v1807_v12  ;;  %v893_v51 = vpop.f32.mrb[9].mxu1  ;;  %1096 = vadd.xlane.f32.xlu0 %v1095_v49  ;;  %v1058_v56 = vmul.f32 %v1814_v16, %v1019_v44 }
 0x1d3   : > { %v894_v52 = vadd.f32 %v1807_v12, %v893_v51  ;;  %v1057_v53 = vmul.f32 %v1814_v16, %v1018_v47 }
 0x1d4   : > { %v1021_v54 = vmax.f32 %v899_v50, 0.0  ;;  %v1104_v1 = vsel %vm690_vm1, %v1058_v56, 0.0 }
 0x1d5   : > { %v1020_v57 = vmax.f32 %v894_v52, 0.0  ;;  %v1533_v58 = vpop.f32.mrb[10].mxu1  ;;  %1099 = vadd.xlane.f32.xlu1 %v1098_v55  ;;  %v1101_v59 = vsel %vm690_vm1, %v1057_v53, 0.0 }
 0x1d6   : > { %v909_v60 = vadd.f32 %v1533_v58, %v1807_v12  ;;  %v903_v61 = vpop.f32.mrb[11].mxu1  ;;  %1102 = vadd.xlane.f32.xlu0 %v1101_v59  ;;  %v1060_v2 = vmul.f32 %v1814_v16, %v1021_v54 }
 0x1d7   : > { %v904_v62 = vadd.f32 %v1807_v12, %v903_v61  ;;  %v1059_v63 = vmul.f32 %v1814_v16, %v1020_v57 }
 0x1d8   : > { %v1023_v0 = vmax.f32 %v909_v60, 0.0  ;;  %v1110_v11 = vsel %vm690_vm1, %v1060_v2, 0.0 }
 0x1d9   : > { %v1022_v3 = vmax.f32 %v904_v62, 0.0  ;;  %v1536_v4 = vpop.f32.mrb[12].mxu1  ;;  %1105 = vadd.xlane.f32.xlu1 %v1104_v1  ;;  %v1107_v5 = vsel %vm690_vm1, %v1059_v63, 0.0 }
 0x1da   : > { %v919_v6 = vadd.f32 %v1536_v4, %v1807_v12  ;;  %v913_v7 = vpop.f32.mrb[13].mxu1  ;;  %1108 = vadd.xlane.f32.xlu0 %v1107_v5  ;;  %v1062_v13 = vmul.f32 %v1814_v16, %v1023_v0 }
 0x1db   : > { %v914_v8 = vadd.f32 %v1807_v12, %v913_v7  ;;  %v1061_v9 = vmul.f32 %v1814_v16, %v1022_v3 }
 0x1dc   : > { %v1025_v10 = vmax.f32 %v919_v6, 0.0  ;;  %v1116_v22 = vsel %vm690_vm1, %v1062_v13, 0.0 }
 0x1dd   : > { %v1024_v14 = vmax.f32 %v914_v8, 0.0  ;;  %v1539_v15 = vpop.f32.mrb[14].mxu1  ;;  %1111 = vadd.xlane.f32.xlu1 %v1110_v11  ;;  %v1113_v42 = vsel %vm690_vm1, %v1061_v9, 0.0 }
 0x1de   : > { %v929_v17 = vadd.f32 %v1539_v15, %v1807_v12  ;;  %v923_v18 = vpop.f32.mrb[15].mxu1  ;;  %1114 = vadd.xlane.f32.xlu0 %v1113_v42  ;;  %v1064_v23 = vmul.f32 %v1814_v16, %v1025_v10 }
 0x1df   : > { %v924_v19 = vadd.f32 %v1807_v12, %v923_v18  ;;  %v1063_v20 = vmul.f32 %v1814_v16, %v1024_v14 }
 0x1e0   : > { %v1027_v21 = vmax.f32 %v929_v17, 0.0  ;;  %v1122_v32 = vsel %vm690_vm1, %v1064_v23, 0.0 }
 0x1e1   : > { %v1026_v24 = vmax.f32 %v924_v19, 0.0  ;;  %v1542_v25 = vpop.f32.mrb[16].mxu1  ;;  %1117 = vadd.xlane.f32.xlu1 %v1116_v22  ;;  %v1119_v26 = vsel %vm690_vm1, %v1063_v20, 0.0 }
 0x1e2   : > { %v939_v27 = vadd.f32 %v1542_v25, %v1807_v12  ;;  %v933_v28 = vpop.f32.mrb[17].mxu1  ;;  %1120 = vadd.xlane.f32.xlu0 %v1119_v26  ;;  %v1066_v33 = vmul.f32 %v1814_v16, %v1027_v21 }
 0x1e3   : > { %v934_v29 = vadd.f32 %v1807_v12, %v933_v28  ;;  %v1065_v30 = vmul.f32 %v1814_v16, %v1026_v24 }
 0x1e4   : > { %v1029_v31 = vmax.f32 %v939_v27, 0.0  ;;  %v1128_v43 = vsel %vm690_vm1, %v1066_v33, 0.0 }
 0x1e5   : > { %v1028_v34 = vmax.f32 %v934_v29, 0.0  ;;  %v1545_v35 = vpop.f32.mrb[18].mxu1  ;;  %1123 = vadd.xlane.f32.xlu1 %v1122_v32  ;;  %v1125_v36 = vsel %vm690_vm1, %v1065_v30, 0.0 }
 0x1e6   : > { %v949_v37 = vadd.f32 %v1545_v35, %v1807_v12  ;;  %v943_v38 = vpop.f32.mrb[19].mxu1  ;;  %1126 = vadd.xlane.f32.xlu0 %v1125_v36  ;;  %v1068_v44 = vmul.f32 %v1814_v16, %v1029_v31 }
 0x1e7   : > { %v944_v39 = vadd.f32 %v1807_v12, %v943_v38  ;;  %v1067_v40 = vmul.f32 %v1814_v16, %v1028_v34 }
 0x1e8   : > { %v1031_v41 = vmax.f32 %v949_v37, 0.0  ;;  %v1134_v53 = vsel %vm690_vm1, %v1068_v44, 0.0 }
 0x1e9   : > { %v1030_v45 = vmax.f32 %v944_v39, 0.0  ;;  %v1548_v46 = vpop.f32.mrb[20].mxu1  ;;  %1129 = vadd.xlane.f32.xlu1 %v1128_v43  ;;  %v1131_v47 = vsel %vm690_vm1, %v1067_v40, 0.0 }
 0x1ea   : > { %v959_v48 = vadd.f32 %v1548_v46, %v1807_v12  ;;  %v953_v49 = vpop.f32.mrb[21].mxu1  ;;  %1132 = vadd.xlane.f32.xlu0 %v1131_v47  ;;  %v1070_v54 = vmul.f32 %v1814_v16, %v1031_v41 }
 0x1eb   : > { %v954_v50 = vadd.f32 %v1807_v12, %v953_v49  ;;  %v1069_v51 = vmul.f32 %v1814_v16, %v1030_v45  ;;  %v1910_v49 = vld [vmem:[#allocation2] ss:$0 sm:$0xff] }
 0x1ec   : > { %v1033_v52 = vmax.f32 %v959_v48, 0.0  ;;  %v1140_v63 = vsel %vm690_vm1, %v1070_v54, 0.0 }
 0x1ed   : > { %v1032_v55 = vmax.f32 %v954_v50, 0.0  ;;  %v1551_v56 = vpop.f32.mrb[22].mxu1  ;;  %1135 = vadd.xlane.f32.xlu1 %v1134_v53  ;;  %v1137_v57 = vsel %vm690_vm1, %v1069_v51, 0.0 }
 0x1ee   : > { %v969_v58 = vadd.f32 %v1551_v56, %v1807_v12  ;;  %v963_v59 = vpop.f32.mrb[23].mxu1  ;;  %1138 = vadd.xlane.f32.xlu0 %v1137_v57  ;;  %v1072_v0 = vmul.f32 %v1814_v16, %v1033_v52 }
 0x1ef   : > { %v964_v60 = vadd.f32 %v1807_v12, %v963_v59  ;;  %v1071_v61 = vmul.f32 %v1814_v16, %v1032_v55 }
 0x1f0   : > { %v1035_v62 = vmax.f32 %v969_v58, 0.0  ;;  %v1146_v9 = vsel %vm690_vm1, %v1072_v0, 0.0 }
 0x1f1   : > { %v1034_v1 = vmax.f32 %v964_v60, 0.0  ;;  %v1554_v2 = vpop.f32.mrb[24].mxu1  ;;  %1141 = vadd.xlane.f32.xlu1 %v1140_v63  ;;  %v1143_v3 = vsel %vm690_vm1, %v1071_v61, 0.0 }
 0x1f2   : > { %v979_v4 = vadd.f32 %v1554_v2, %v1807_v12  ;;  %v973_v5 = vpop.f32.mrb[25].mxu1  ;;  %1144 = vadd.xlane.f32.xlu0 %v1143_v3  ;;  %v1074_v10 = vmul.f32 %v1814_v16, %v1035_v62 }
 0x1f3   : > { %v974_v6 = vadd.f32 %v1807_v12, %v973_v5  ;;  %v1073_v7 = vmul.f32 %v1814_v16, %v1034_v1 }
 0x1f4   : > { %v1037_v8 = vmax.f32 %v979_v4, 0.0  ;;  %v1152_v20 = vsel %vm690_vm1, %v1074_v10, 0.0 }
 0x1f5   : > { %v1036_v11 = vmax.f32 %v974_v6, 0.0  ;;  %v1557_v13 = vpop.f32.mrb[26].mxu1  ;;  %1147 = vadd.xlane.f32.xlu1 %v1146_v9  ;;  %v1149_v14 = vsel %vm690_vm1, %v1073_v7, 0.0 }
 0x1f6   : > { %v989_v15 = vadd.f32 %v1557_v13, %v1807_v12  ;;  %v983_v42 = vpop.f32.mrb[27].mxu1  ;;  %1150 = vadd.xlane.f32.xlu0 %v1149_v14  ;;  %v1076_v21 = vmul.f32 %v1814_v16, %v1037_v8 }
 0x1f7   : > { %v984_v17 = vadd.f32 %v1807_v12, %v983_v42  ;;  %v1075_v18 = vmul.f32 %v1814_v16, %v1036_v11 }
 0x1f8   : > { %v1039_v19 = vmax.f32 %v989_v15, 0.0  ;;  %v1158_v30 = vsel %vm690_vm1, %v1076_v21, 0.0 }
 0x1f9   : > { %v1038_v22 = vmax.f32 %v984_v17, 0.0  ;;  %v1560_v23 = vpop.f32.mrb[28].mxu1  ;;  %1153 = vadd.xlane.f32.xlu1 %v1152_v20  ;;  %v1155_v24 = vsel %vm690_vm1, %v1075_v18, 0.0 }
 0x1fa   : > { %v999_v25 = vadd.f32 %v1560_v23, %v1807_v12  ;;  %v993_v26 = vpop.f32.mrb[29].mxu1  ;;  %1156 = vadd.xlane.f32.xlu0 %v1155_v24  ;;  %v1078_v31 = vmul.f32 %v1814_v16, %v1039_v19 }
 0x1fb   : > { %v994_v27 = vadd.f32 %v1807_v12, %v993_v26  ;;  %v1077_v28 = vmul.f32 %v1814_v16, %v1038_v22 }
 0x1fc   : > { %v1041_v29 = vmax.f32 %v999_v25, 0.0  ;;  %v1164_v40 = vsel %vm690_vm1, %v1078_v31, 0.0 }
 0x1fd   : > { %v1040_v32 = vmax.f32 %v994_v27, 0.0  ;;  %v1563_v33 = vpop.f32.mrb[30].mxu1  ;;  %1159 = vadd.xlane.f32.xlu1 %v1158_v30  ;;  %v1161_v34 = vsel %vm690_vm1, %v1077_v28, 0.0 }
 0x1fe   : > { %v1009_v35 = vadd.f32 %v1563_v33, %v1807_v12  ;;  %v1003_v36 = vpop.f32.mrb[31].mxu1  ;;  %1162 = vadd.xlane.f32.xlu0 %v1161_v34  ;;  %v1080_v41 = vmul.f32 %v1814_v16, %v1041_v29 }
 0x1ff   : > { %v1004_v37 = vadd.f32 %v1807_v12, %v1003_v36  ;;  %v1079_v38 = vmul.f32 %v1814_v16, %v1040_v32 }
 0x200   : > { %v1043_v39 = vmax.f32 %v1009_v35, 0.0  ;;  %v1170_v47 = vsel %vm690_vm1, %v1080_v41, 0.0 }
 0x201   : > { %v1042_v43 = vmax.f32 %v1004_v37, 0.0  ;;  %1165 = vadd.xlane.f32.xlu1 %v1164_v40  ;;  %v1167_v44 = vsel %vm690_vm1, %v1079_v38, 0.0 }
 0x202   : > { %1168 = vadd.xlane.f32.xlu0 %v1167_v44  ;;  %v1082_v45 = vmul.f32 %v1814_v16, %v1043_v39 }
 0x203   : > { %v1081_v46 = vmul.f32 %v1814_v16, %v1042_v43 }
 0x204   : > { %v1176_v48 = vsel %vm690_vm1, %v1082_v45, 0.0 }
 0x205   : > { %1171 = vadd.xlane.f32.xlu1 %v1170_v47  ;;  %v1173_v12 = vsel %vm690_vm1, %v1081_v46, 0.0 }
 0x206   : > { %1174 = vadd.xlane.f32.xlu0 %v1173_v12 }
 0x209   : > { %1177 = vadd.xlane.f32.xlu1 %v1176_v48 }
 0x256   : > { %v1088_v16 = vpop.xlane.xlu0 %1087 }
 0x257   : > { %v1187_v50 = vadd.f32 %v1910_v49, %v1088_v16 }
 0x259   : > { %1220 = vst.msk [vmem:[%s1917_s6 + $0x8] sm:$0xff] %vm1218_vm2, %v1187_v50 }
 0x25a   : > { %v1094_v51 = vpop.xlane.xlu1 %1093  ;;  %v1085_v52 = vpop.xlane.xlu0 %1084 }
 0x25b   : > { %v1189_v53 = vadd.f32 %v1910_v49, %v1094_v51  ;;  %v1186_v54 = vadd.f32 %v1910_v49, %v1085_v52 }
 0x25d   : > { %1222 = vst.msk [vmem:[%s1917_s6 + $0x18] sm:$0xff] %vm1218_vm2, %v1189_v53  ;;  %1219 = vst.msk [vmem:[%s1917_s6] sm:$0xff] %vm1218_vm2, %v1186_v54 }
 0x25e   : > { %v1091_v55 = vpop.xlane.xlu1 %1090 }
 0x25f   : > { %v1188_v56 = vadd.f32 %v1910_v49, %v1091_v55  ;;  %v1097_v57 = vpop.xlane.xlu0 %1096 }
 0x260   : > { %v1190_v58 = vadd.f32 %v1910_v49, %v1097_v57 }
 0x261   : > { %1221 = vst.msk [vmem:[%s1917_s6 + $0x10] sm:$0xff] %vm1218_vm2, %v1188_v56 }
 0x262   : > { %1223 = vst.msk [vmem:[%s1917_s6 + $0x20] sm:$0xff] %vm1218_vm2, %v1190_v58  ;;  %v1100_v59 = vpop.xlane.xlu1 %1099 }
 0x263   : > { %v1191_v60 = vadd.f32 %v1910_v49, %v1100_v59  ;;  %v1103_v61 = vpop.xlane.xlu0 %1102 }
 0x264   : > { %v1192_v62 = vadd.f32 %v1910_v49, %v1103_v61 }
 0x265   : > { %1224 = vst.msk [vmem:[%s1917_s6 + $0x28] sm:$0xff] %vm1218_vm2, %v1191_v60 }
 0x266   : > { %1225 = vst.msk [vmem:[%s1917_s6 + $0x30] sm:$0xff] %vm1218_vm2, %v1192_v62  ;;  %v1106_v63 = vpop.xlane.xlu1 %1105 }
 0x267   : > { %v1193_v0 = vadd.f32 %v1910_v49, %v1106_v63  ;;  %v1109_v1 = vpop.xlane.xlu0 %1108 }
 0x268   : > { %v1194_v2 = vadd.f32 %v1910_v49, %v1109_v1 }
 0x269   : > { %1226 = vst.msk [vmem:[%s1917_s6 + $0x38] sm:$0xff] %vm1218_vm2, %v1193_v0 }
 0x26a   : > { %1227 = vst.msk [vmem:[%s1917_s6 + $0x40] sm:$0xff] %vm1218_vm2, %v1194_v2  ;;  %v1112_v3 = vpop.xlane.xlu1 %1111 }
 0x26b   : > { %v1195_v4 = vadd.f32 %v1910_v49, %v1112_v3  ;;  %v1115_v5 = vpop.xlane.xlu0 %1114 }
 0x26c   : > { %v1196_v6 = vadd.f32 %v1910_v49, %v1115_v5 }
 0x26d   : > { %1228 = vst.msk [vmem:[%s1917_s6 + $0x48] sm:$0xff] %vm1218_vm2, %v1195_v4 }
 0x26e   : > { %1229 = vst.msk [vmem:[%s1917_s6 + $0x50] sm:$0xff] %vm1218_vm2, %v1196_v6  ;;  %v1118_v7 = vpop.xlane.xlu1 %1117 }
 0x26f   : > { %v1197_v8 = vadd.f32 %v1910_v49, %v1118_v7  ;;  %v1121_v9 = vpop.xlane.xlu0 %1120 }
 0x270   : > { %v1198_v10 = vadd.f32 %v1910_v49, %v1121_v9 }
 0x271   : > { %1230 = vst.msk [vmem:[%s1917_s6 + $0x58] sm:$0xff] %vm1218_vm2, %v1197_v8 }
 0x272   : > { %1231 = vst.msk [vmem:[%s1917_s6 + $0x60] sm:$0xff] %vm1218_vm2, %v1198_v10  ;;  %v1124_v11 = vpop.xlane.xlu1 %1123 }
 0x273   : > { %v1199_v13 = vadd.f32 %v1910_v49, %v1124_v11  ;;  %v1127_v14 = vpop.xlane.xlu0 %1126 }
 0x274   : > { %v1200_v15 = vadd.f32 %v1910_v49, %v1127_v14 }
 0x275   : > { %1232 = vst.msk [vmem:[%s1917_s6 + $0x68] sm:$0xff] %vm1218_vm2, %v1199_v13 }
 0x276   : > { %1233 = vst.msk [vmem:[%s1917_s6 + $0x70] sm:$0xff] %vm1218_vm2, %v1200_v15  ;;  %v1130_v42 = vpop.xlane.xlu1 %1129 }
 0x277   : > { %v1201_v17 = vadd.f32 %v1910_v49, %v1130_v42  ;;  %v1133_v18 = vpop.xlane.xlu0 %1132 }
 0x278   : > { %v1202_v19 = vadd.f32 %v1910_v49, %v1133_v18 }
 0x279   : > { %1234 = vst.msk [vmem:[%s1917_s6 + $0x78] sm:$0xff] %vm1218_vm2, %v1201_v17 }
 0x27a   : > { %1235 = vst.msk [vmem:[%s1917_s6 + $0x80] sm:$0xff] %vm1218_vm2, %v1202_v19  ;;  %v1136_v20 = vpop.xlane.xlu1 %1135 }
 0x27b   : > { %v1203_v21 = vadd.f32 %v1910_v49, %v1136_v20  ;;  %v1139_v22 = vpop.xlane.xlu0 %1138 }
 0x27c   : > { %v1204_v23 = vadd.f32 %v1910_v49, %v1139_v22 }
 0x27d   : > { %1236 = vst.msk [vmem:[%s1917_s6 + $0x88] sm:$0xff] %vm1218_vm2, %v1203_v21 }
 0x27e   : > { %1237 = vst.msk [vmem:[%s1917_s6 + $0x90] sm:$0xff] %vm1218_vm2, %v1204_v23  ;;  %v1142_v24 = vpop.xlane.xlu1 %1141 }
 0x27f   : > { %v1205_v25 = vadd.f32 %v1910_v49, %v1142_v24  ;;  %v1145_v26 = vpop.xlane.xlu0 %1144 }
 0x280   : > { %v1206_v27 = vadd.f32 %v1910_v49, %v1145_v26 }
 0x281   : > { %1238 = vst.msk [vmem:[%s1917_s6 + $0x98] sm:$0xff] %vm1218_vm2, %v1205_v25 }
 0x282   : > { %1239 = vst.msk [vmem:[%s1917_s6 + $0xa0] sm:$0xff] %vm1218_vm2, %v1206_v27  ;;  %v1148_v28 = vpop.xlane.xlu1 %1147 }
 0x283   : > { %v1207_v29 = vadd.f32 %v1910_v49, %v1148_v28  ;;  %v1151_v30 = vpop.xlane.xlu0 %1150 }
 0x284   : > { %v1208_v31 = vadd.f32 %v1910_v49, %v1151_v30 }
 0x285   : > { %1240 = vst.msk [vmem:[%s1917_s6 + $0xa8] sm:$0xff] %vm1218_vm2, %v1207_v29 }
 0x286   : > { %1241 = vst.msk [vmem:[%s1917_s6 + $0xb0] sm:$0xff] %vm1218_vm2, %v1208_v31  ;;  %v1154_v32 = vpop.xlane.xlu1 %1153 }
 0x287   : > { %v1209_v33 = vadd.f32 %v1910_v49, %v1154_v32  ;;  %v1157_v34 = vpop.xlane.xlu0 %1156 }
 0x288   : > { %v1210_v35 = vadd.f32 %v1910_v49, %v1157_v34 }
 0x289   : > { %1242 = vst.msk [vmem:[%s1917_s6 + $0xb8] sm:$0xff] %vm1218_vm2, %v1209_v33 }
 0x28a   : > { %1243 = vst.msk [vmem:[%s1917_s6 + $0xc0] sm:$0xff] %vm1218_vm2, %v1210_v35  ;;  %v1160_v36 = vpop.xlane.xlu1 %1159 }
 0x28b   : > { %v1211_v37 = vadd.f32 %v1910_v49, %v1160_v36  ;;  %v1163_v38 = vpop.xlane.xlu0 %1162 }
 0x28c   : > { %v1212_v39 = vadd.f32 %v1910_v49, %v1163_v38 }
 0x28d   : > { %1244 = vst.msk [vmem:[%s1917_s6 + $0xc8] sm:$0xff] %vm1218_vm2, %v1211_v37 }
 0x28e   : > { %1245 = vst.msk [vmem:[%s1917_s6 + $0xd0] sm:$0xff] %vm1218_vm2, %v1212_v39  ;;  %v1166_v40 = vpop.xlane.xlu1 %1165 }
 0x28f   : > { %v1213_v41 = vadd.f32 %v1910_v49, %v1166_v40  ;;  %v1169_v43 = vpop.xlane.xlu0 %1168 }
 0x290   : > { %v1214_v44 = vadd.f32 %v1910_v49, %v1169_v43 }
 0x291   : > { %1246 = vst.msk [vmem:[%s1917_s6 + $0xd8] sm:$0xff] %vm1218_vm2, %v1213_v41 }
 0x292   : > { %1247 = vst.msk [vmem:[%s1917_s6 + $0xe0] sm:$0xff] %vm1218_vm2, %v1214_v44  ;;  %v1172_v45 = vpop.xlane.xlu1 %1171 }
 0x293   : > { %v1215_v46 = vadd.f32 %v1910_v49, %v1172_v45  ;;  %v1175_v47 = vpop.xlane.xlu0 %1174 }
 0x294   : > { %v1216_v12 = vadd.f32 %v1910_v49, %v1175_v47 }
 0x295   : > { %1248 = vst.msk [vmem:[%s1917_s6 + $0xe8] sm:$0xff] %vm1218_vm2, %v1215_v46 }
 0x296   : > { %1249 = vst.msk [vmem:[%s1917_s6 + $0xf0] sm:$0xff] %vm1218_vm2, %v1216_v12  ;;  %v1178_v48 = vpop.xlane.xlu1 %1177 }
 0x297   : > { %v1217_v16 = vadd.f32 %v1910_v49, %v1178_v48 }
 0x299   : > { %1250 = vst.msk [vmem:[%s1917_s6 + $0xf8] sm:$0xff] %vm1218_vm2, %v1217_v16 }
 0x29a PF: > { %s19_s26 = sadd.s32 1, %s1590_s26  }
 0x29b   : > { %p16_p4 = scmp.ge.s32.totalorder %s19_s26, 6  }
 0x29d   :  { %18 = sbr.rel (!%p16_p4) target bundleno = 3 (0x3), region = 78 }

</bundles_post_ra>
